<compile_context>
chip_gen: v7x
topology: tpu7x:2x2x1
jax: 0.10.0
libtpu: 0.0.40
codegen_flags: <defaults>
</compile_context>

<pallas_src>
import functools

import jax
import jax.numpy as jnp
from jax.experimental import pallas as pl
from jax.experimental.pallas import tpu as pltpu


def _gem_kernel(p_ref, x_ref, o_ref, acc_ref, *, eps, inv_hw, hw, block_hw):
    # p_ref:   (1,)                         f32 in SMEM (learnable GeM exponent)
    # x_ref:   (block_b, block_c, block_hw) native dtype in VMEM (one tile)
    # o_ref:   (block_b, block_c)           output tile (channels on lanes)
    # acc_ref: (block_b, block_c)           f32 running sum of x^p over HW
    hw_idx = pl.program_id(2)

    @pl.when(hw_idx == 0)
    def _init():
        acc_ref[...] = jnp.zeros_like(acc_ref)

    p = p_ref[0]
    x = x_ref[...].astype(jnp.float32)            # in-kernel upcast (no HBM cast pass)
    x = jnp.maximum(x, eps)                       # clamp(min=eps) -> strictly positive
    xp = jnp.exp(p * jnp.log(x))                  # x^p on the EUP

    if hw % block_hw != 0:                        # static check: mask padded lanes
        lane = jax.lax.broadcasted_iota(jnp.int32, xp.shape, dimension=2)
        valid = (hw_idx * block_hw + lane) < hw
        xp = jnp.where(valid, xp, 0.0)

    acc_ref[...] += jnp.sum(xp, axis=-1)          # lane-axis XLU reduce

    @pl.when(hw_idx == pl.num_programs(2) - 1)
    def _finalize():
        inv_p = 1.0 / p                           # scalar reciprocal, computed once
        mean_p = acc_ref[...] * inv_hw
        o_ref[...] = jnp.exp(jnp.log(mean_p) * inv_p).astype(o_ref.dtype)


def _choose_tiles(B, C, HW, itemsize):
    # Batch tile: 8 sublanes with cdiv (padded rows are masked on store).
    block_b = 8 if B >= 8 else B
    num_b = pl.cdiv(B, block_b)

    # Channel tile: only multiples of 128 keep output stores lane-dense & legal.
    if C % 128 == 0 and C > 128:
        block_c = min(C, 512)
        if num_b == 1 and block_c == C and (C // 2) % 128 == 0:
            block_c = C // 2            # guarantee >=2 "parallel" steps (v7x megacore)
    else:
        block_c = C

    # Spatial tile: bounded multiple of 128 (or full extent when small) so a
    # double-buffered input tile stays well inside the scoped VMEM budget.
    tile_budget = 8 * 1024 * 1024       # bytes per input buffer (x2 double-buffered)
    if HW <= 256:
        block_hw = HW
    else:
        by_budget = tile_budget // max(1, block_b * block_c * itemsize)
        block_hw = min(HW, 2048, by_budget)
        block_hw = max(128, (block_hw // 128) * 128)
        if block_hw >= HW:
            block_hw = HW
    return block_b, block_c, block_hw


def gem_pool(x, p, eps=1e-6):
    """GeM pooling. x: (B, C, H, W) -> (B, C, 1, 1). p: shape-(1,) parameter."""
    B, C, H, W = x.shape
    HW = H * W
    x3 = x.reshape(B, C, HW)                      # free reshape, native dtype
    itemsize = jnp.dtype(x3.dtype).itemsize

    block_b, block_c, block_hw = _choose_tiles(B, C, HW, itemsize)
    grid = (pl.cdiv(B, block_b), pl.cdiv(C, block_c), pl.cdiv(HW, block_hw))

    kernel = functools.partial(
        _gem_kernel, eps=float(eps), inv_hw=1.0 / HW, hw=HW, block_hw=block_hw)

    cost = pl.CostEstimate(
        flops=3 * B * C * HW,
        transcendentals=2 * B * C * HW + 2 * B * C,
        bytes_accessed=B * C * HW * itemsize + B * C * itemsize,
    )

    out = pl.pallas_call(
        kernel,
        out_shape=jax.ShapeDtypeStruct((B, C), x.dtype),
        grid=grid,
        in_specs=[
            pl.BlockSpec(memory_space=pltpu.MemorySpace.SMEM),            # scalar p
            pl.BlockSpec((block_b, block_c, block_hw),
                         lambda b, c, k: (b, c, k)),                      # input tile
        ],
        out_specs=pl.BlockSpec((block_b, block_c), lambda b, c, k: (b, c)),
        scratch_shapes=[pltpu.VMEM((block_b, block_c), jnp.float32)],
        compiler_params=pltpu.CompilerParams(
            dimension_semantics=("parallel", "parallel", "arbitrary"),
            vmem_limit_bytes=48 * 1024 * 1024,
        ),
        cost_estimate=cost,
    )(jnp.asarray(p, jnp.float32).reshape(1), x3)

    return out.reshape(B, C, 1, 1)


def gem_reference(x, p, eps=1e-6):
    """Pure-JAX reference: F.avg_pool2d(x.clamp(min=eps)**p, (H, W))**(1/p)."""
    xc = jnp.maximum(x.astype(jnp.float32), eps)
    pooled = jnp.mean(xc ** p.astype(jnp.float32), axis=(-2, -1))
    return (pooled ** (1.0 / p.astype(jnp.float32))).reshape(
        x.shape[0], x.shape[1], 1, 1)


if __name__ == "__main__":
    key = jax.random.PRNGKey(0)
    p = jnp.ones((1,), jnp.float32) * 3.0        # GeM default p=3 (learnable scalar)

    # (B, C, H, W, dtype, atol, rtol)
    cases = [
        ((2, 4, 16, 16), jnp.float32, 1e-5, 1e-4),    # spec shape, tiny / full-extent
        ((16, 256, 16, 16), jnp.float32, 1e-5, 1e-4), # aligned, 2 parallel batch steps
        ((8, 128, 20, 20), jnp.float32, 1e-5, 1e-4),  # HW tiling + partial-tile mask
        ((10, 64, 16, 16), jnp.bfloat16, 2e-2, 2e-2), # padded batch rows, bf16 input
    ]
    for shape, dtype, atol, rtol in cases:
        k_x, key = jax.random.split(key)
        x = jax.random.uniform(k_x, shape, jnp.float32).astype(dtype)

        out = jax.block_until_ready(gem_pool(x, p))
        ref = gem_reference(x, p)

        assert out.shape == (shape[0], shape[1], 1, 1), out.shape
        assert out.dtype == dtype, out.dtype
        err = float(jnp.max(jnp.abs(out.astype(jnp.float32) - ref)))
        assert jnp.allclose(out.astype(jnp.float32), ref, atol=atol, rtol=rtol), (
            f"mismatch vs reference for shape {shape} dtype {dtype}: max abs err {err}")

    print("KERNEL_OK")
</pallas_src>

<mosaic_0001>
module attributes {stable_mosaic.version = 11 : i64} {
  func.func @_gem_kernel(%arg0: i32, %arg1: i32, %arg2: i32, %arg3: memref<1xf32, #tpu.memory_space<smem>>, %arg4: memref<2x4x256xf32, #tpu.memory_space<vmem>>, %arg5: memref<2x4xf32, #tpu.memory_space<vmem>>, %arg6: memref<2x4xf32, #tpu.memory_space<vmem>>) attributes {dimension_semantics = [#tpu.dimension_semantics<parallel>, #tpu.dimension_semantics<parallel>, #tpu.dimension_semantics<arbitrary>], iteration_bounds = array<i64: 1, 1, 1>, scalar_prefetch = 0 : i64, scratch_operands = 1 : i64, tpu.core_type = #tpu.core_type<tc>, window_params = [{transform_indices = @transform_0, window_bounds = array<i64: 1>}, {transform_indices = @transform_1, window_bounds = array<i64: 2, 4, 256>}, {transform_indices = @transform_2, window_bounds = array<i64: 2, 4>}]} {
    %c0_i32 = arith.constant 0 : i32
    %0 = arith.cmpi eq, %arg2, %c0_i32 : i32
    %1 = arith.extui %0 : i1 to i32
    %c0_i32_0 = arith.constant 0 : i32
    %2 = arith.cmpi ne, %1, %c0_i32_0 : i32
    scf.if %2 {
      %cst_11 = arith.constant 0.000000e+00 : f32
      %18 = vector.broadcast %cst_11 : f32 to vector<2x4xf32>
      %c0_12 = arith.constant 0 : index
      %c0_13 = arith.constant 0 : index
      %19 = vector.load %arg6[%c0_12, %c0_13] : memref<2x4xf32, #tpu.memory_space<vmem>>, vector<2x4xf32>
      tpu.vector_store %arg6[%c0_12, %c0_13], %18 {strides = array<i32>} : memref<2x4xf32, #tpu.memory_space<vmem>>, vector<2x4xf32>,
    } else {
    }
    %c0 = arith.constant 0 : index
    %3 = memref.load %arg3[%c0] : memref<1xf32, #tpu.memory_space<smem>>
    %c0_1 = arith.constant 0 : index
    %c0_2 = arith.constant 0 : index
    %c0_3 = arith.constant 0 : index
    %4 = vector.load %arg4[%c0_1, %c0_2, %c0_3] : memref<2x4x256xf32, #tpu.memory_space<vmem>>, vector<2x4x256xf32>
    %cst = arith.constant 9.99999997E-7 : f32
    %5 = vector.broadcast %cst : f32 to vector<2x4x256xf32>
    %6 = arith.maximumf %4, %5 : vector<2x4x256xf32>
    %7 = math.log %6 : vector<2x4x256xf32>
    %8 = vector.broadcast %3 : f32 to vector<2x4x256xf32>
    %9 = arith.mulf %8, %7 : vector<2x4x256xf32>
    %10 = math.exp %9 : vector<2x4x256xf32>
    %c0_4 = arith.constant 0 : index
    %c0_5 = arith.constant 0 : index
    %11 = vector.load %arg6[%c0_4, %c0_5] : memref<2x4xf32, #tpu.memory_space<vmem>>, vector<2x4xf32>
    %cst_6 = arith.constant dense<0.000000e+00> : vector<2x4xf32>
    %12 = vector.multi_reduction <add>, %10, %cst_6 [2] : vector<2x4x256xf32> to vector<2x4xf32>
    %13 = arith.addf %11, %12 : vector<2x4xf32>
    %c0_7 = arith.constant 0 : index
    %c0_8 = arith.constant 0 : index
    %14 = vector.load %arg6[%c0_7, %c0_8] : memref<2x4xf32, #tpu.memory_space<vmem>>, vector<2x4xf32>
    tpu.vector_store %arg6[%c0_7, %c0_8], %13 {strides = array<i32>} : memref<2x4xf32, #tpu.memory_space<vmem>>, vector<2x4xf32>,
    %c0_i32_9 = arith.constant 0 : i32
    %15 = arith.cmpi eq, %arg2, %c0_i32_9 : i32
    %16 = arith.extui %15 : i1 to i32
    %c0_i32_10 = arith.constant 0 : i32
    %17 = arith.cmpi ne, %16, %c0_i32_10 : i32
    scf.if %17 {
      %cst_11 = arith.constant 1.000000e+00 : f32
      %18 = arith.divf %cst_11, %3 : f32
      %c0_12 = arith.constant 0 : index
      %c0_13 = arith.constant 0 : index
      %19 = vector.load %arg6[%c0_12, %c0_13] : memref<2x4xf32, #tpu.memory_space<vmem>>, vector<2x4xf32>
      %cst_14 = arith.constant 3.906250e-03 : f32
      %20 = vector.broadcast %cst_14 : f32 to vector<2x4xf32>
      %21 = arith.mulf %19, %20 : vector<2x4xf32>
      %22 = math.log %21 : vector<2x4xf32>
      %23 = vector.broadcast %18 : f32 to vector<2x4xf32>
      %24 = arith.mulf %22, %23 : vector<2x4xf32>
      %25 = math.exp %24 : vector<2x4xf32>
      %c0_15 = arith.constant 0 : index
      %c0_16 = arith.constant 0 : index
      %26 = vector.load %arg5[%c0_15, %c0_16] : memref<2x4xf32, #tpu.memory_space<vmem>>, vector<2x4xf32>
      tpu.vector_store %arg5[%c0_15, %c0_16], %25 {strides = array<i32>} : memref<2x4xf32, #tpu.memory_space<vmem>>, vector<2x4xf32>,
    } else {
    }
    return
  }
  func.func @transform_0(%arg0: i32, %arg1: i32, %arg2: i32) -> i32 {
    %c0_i32 = arith.constant 0 : i32
    %c0_i32_0 = arith.constant 0 : i32
    return %c0_i32 : i32
  }
  func.func @transform_1(%arg0: i32, %arg1: i32, %arg2: i32) -> (i32, i32, i32) {
    %c0_i32 = arith.constant 0 : i32
    return %arg0, %arg1, %arg2 : i32, i32, i32
  }
  func.func @transform_2(%arg0: i32, %arg1: i32, %arg2: i32) -> (i32, i32) {
    %c0_i32 = arith.constant 0 : i32
    return %arg0, %arg1 : i32, i32
  }
}

</mosaic_0001>

<bundles_post_ra>
// kernel: tpu_custom_call.1
= control target key start
LH: loop header
LB: loop body
LE: loop exit
PB: predicated region body
PF: predicated region fallthrough
CT: control target
= control target key end

     0   :  { %8 = vsyncpa [#allocation5], 0  ;;  %s234_s0 = inlined_call_operand.<no memory space> [shape: f32[1], index: 0, kind: input, shape index: {}]   ;;  %s235_s1 = inlined_call_operand.hbm [shape: f32[2,4,256], index: 1, kind: input, shape index: {}]   ;;  %s236_s2 = inlined_call_operand.hbm [shape: f32[2,4], index: 2, kind: output, shape index: {}]  }
   0x1   :  { %9 = vsyncpa [#allocation6], 0  ;;  %s184_s9 = smov [#allocation4]   ;;  %s136_s13 = scalar_lea.hbm %s235_s1, 256 }
   0x2   :  { %s17_s10 = sshll.u32 %s184_s9, 4  ;;  %p137_p0 = scmp.ne.s32.totalorder %s235_s1, %s136_s13  ;;  %s18_s10 = int_to_ptr.vmem [resolvable:$true] %s17_s10 }
   0x3   :  { %p140_p1 = scmp.lt.u32.totalorder %s136_s13, %s235_s1 }
   0x5   :  { %p142_p2 = pnand %p140_p1, %p137_p0 }
   0x7   :  { %145 = shalt.err (!%p142_p2)
}
   0x8   :  { %s146_s18 = scalar_lea.vmem %s18_s10, 256  ;;  %p151_p4 = scmp.lt.s32.totalorder %s18_s10, %s18_s10 }
   0x9   :  { %p147_p3 = scmp.ne.s32.totalorder %s18_s10, %s146_s18  ;;  %p152_p5 = scmp.lt.s32.totalorder %s146_s18, %s146_s18 }
   0xb   :  { %p153_p6 = por %p152_p5, %p151_p4 }
   0xd   :  { %p154_p7 = pnand %p153_p6, %p147_p3 }
   0xf   :  { %157 = shalt.err (!%p154_p7)
}
  0x10   :  { %s185_s19 = smov 128   ;;  %s186_s20 = smov 8  }
  0x11   :  { %23 = dma.hbm_to_vmem [thread:$0]  %s235_s1, 256, %s18_s10, [#allocation5], %s185_s19, %s185_s19, %s186_s20  }
  0x12   :  { %180 = dma.done.wait [#allocation5], 256  }
  0x13   :  { %181 = vsyncadd [#allocation5], 4294967040  ;;  %v42_v0 = vstv %s234_s0  ;;  %v34_v1 = vld [vmem:[#allocation4] sm:$0xff]  ;;  %v35_v2 = vld [vmem:[#allocation4 + $0x8] sm:$0xff]  ;;  %vm56_vm0 = vcmask 1043456   ;;  %vm31_vm1 = vcmask 25600   ;;  %v69_v25 = vlaneseq }
  0x14   :  { %122 = vrcp.f32 %v42_v0  ;;  %v36_v3 = vmax.f32 %v34_v1, 1e-06  ;;  %v37_v4 = vmax.f32 %v35_v2, 1e-06  ;;  %v187_v24 = vmov 0.0   ;;  %s188_s1 = smov [#allocation7]  }
  0x15   :  { %32 = vst.msk [vmem:[#allocation2] sm:$0x3] %vm31_vm1, %v187_v24  ;;  %v70_v26 = vand.u32 127, %v69_v25  ;;  %v72_v27 = vshrl.u32 %v69_v25, 7  ;;  %vm79_vm2 = vcmask 1041409   ;;  %s106_s25 = sshll.u32 %s188_s1, 4  ;;  %s107_s25 = int_to_ptr.vmem [resolvable:$true] %s106_s25 }
  0x16   :  { %124 = vlog2.f32 %v36_v3  ;;  %s158_s26 = scalar_lea.vmem %s107_s25, 32  ;;  %p163_p9 = scmp.lt.s32.totalorder %s107_s25, %s107_s25 }
  0x17   :  { %126 = vlog2.f32 %v37_v4  ;;  %v73_v29 = vsub.s32 %v70_v26, %v72_v27  ;;  %p159_p8 = scmp.ne.s32.totalorder %s107_s25, %s158_s26  ;;  %p164_p10 = scmp.lt.s32.totalorder %s158_s26, %s158_s26 }
  0x19   :  { %p165_p11 = por %p164_p10, %p163_p9 }
  0x1b   :  { %p166_p12 = pnand %p165_p11, %p159_p8 }
  0x1c   :  { %v49_v33 = vld [vmem:[#allocation2] sm:$0x3] }
  0x1e   :  { %v123_v5 = vpop.eup %122 }
  0x1f   :  { %115 = vpush %v123_v5 }
  0x20   :  { %v125_v6 = vpop.eup %124 }
  0x21   :  { %v127_v7 = vpop.eup %126  ;;  %v39_v8 = vmul.f32 0.6931472, %v125_v6 }
  0x22   :  { %v41_v9 = vmul.f32 0.6931472, %v127_v7 }
  0x23   :  { %v43_v10 = vmul.f32 %v42_v0, %v39_v8 }
  0x24   :  { %v44_v11 = vmul.f32 %v42_v0, %v41_v9 }
  0x25   :  { %v45_v12 = vmul.f32 1.442695, %v43_v10 }
  0x26   :  { %v47_v13 = vmul.f32 1.442695, %v44_v11 }
  0x27   :  { %128 = vpow2.f32 %v45_v12 }
  0x28   :  { %130 = vpow2.f32 %v47_v13 }
  0x31   :  { %v129_v14 = vpop.eup %128 }
  0x32   :  { %v131_v15 = vpop.eup %130  ;;  %v52_v16 = vcombine.high %v129_v14, %v129_v14  ;;  %v57_v17 = vsel %vm56_vm0, %v129_v14, 0.0 }
  0x33   :  { %v53_v18 = vcombine.high %v131_v15, %v131_v15  ;;  %v62_v20 = vsel %vm56_vm0, %v131_v15, 0.0 }
  0x34   :  { %v58_v19 = vsel %vm56_vm0, %v52_v16, 0.0 }
  0x35   :  { %v59_v21 = vadd.f32 %v58_v19, %v57_v17  ;;  %v63_v22 = vsel %vm56_vm0, %v53_v18, 0.0 }
  0x36   :  { %v64_v23 = vadd.f32 %v63_v22, %v62_v20 }
  0x37   :  { %60 = vadd.xlane.f32.xlu0 %v59_v21 }
  0x3b   :  { %65 = vadd.xlane.f32.xlu0 %v64_v23 }
  0x50   :  { %s116_s0 = spop %115 }
  0x51   :  { %v95_v39 = vstv %s116_s0 }
  0xc4   :  { %v61_v28 = vpop.xlane.xlu0 %60 }
  0xc5   :  { %v74_v31 = vrot.slane %v61_v28, %v73_v29 }
  0xc8   :  { %v66_v30 = vpop.xlane.xlu0 %65 }
  0xc9   :  { %v78_v32 = vrot.slane %v66_v30, %v73_v29 }
  0xcb   :  { %v80_v34 = vsel %vm79_vm2, %v78_v32, %v74_v31 }
  0xcc   :  { %v82_v35 = vadd.f32 %v80_v34, %v49_v33 }
  0xce   :  { %84 = vst.msk [vmem:[#allocation2] sm:$0x3] %vm31_vm1, %v82_v35 }
  0xd5   :  { %v91_v36 = vld [vmem:[#allocation2] sm:$0x3] }
  0xd6   :  { %v92_v37 = vmul.f32 0.00390625, %v91_v36 }
  0xd8   :  { %132 = vlog2.f32 %v92_v37 }
  0xe2   :  { %v133_v38 = vpop.eup %132 }
  0xe3   :  { %v94_v40 = vmul.f32 0.6931472, %v133_v38 }
  0xe5   :  { %v96_v41 = vmul.f32 %v95_v39, %v94_v40 }
  0xe7   :  { %v97_v42 = vmul.f32 1.442695, %v96_v41 }
  0xe9   :  { %134 = vpow2.f32 %v97_v42 }
  0xf3   :  { %v135_v43 = vpop.eup %134 }
  0xf4   :  { %99 = vst.msk [vmem:[#allocation7] sm:$0x3] %vm31_vm1, %v135_v43 }
  0xf5   :  { %169 = shalt.err (!%p166_p12)
}
  0xf6   :  { %s170_s29 = scalar_lea.hbm %s236_s2, 32 }
  0xf7   :  { %p171_p13 = scmp.ne.s32.totalorder %s236_s2, %s170_s29  ;;  %p174_p0 = scmp.lt.u32.totalorder %s170_s29, %s236_s2 }
  0xf9   :  { %p176_p1 = pnand %p174_p0, %p171_p13 }
  0xfb   :  { %179 = shalt.err (!%p176_p1)
}
  0xfc   :  { %109 = dma.vmem_to_hbm [thread:$0]  %s107_s25, 32, %s236_s2, [#allocation6]  }
  0xfd   :  { %182 = dma.done.wait [#allocation6], 32  }
  0xfe   :  { %183 = vsyncadd [#allocation6], 4294967264 }
  0xff   :  { %113 = vsyncpa [#allocation5], 1 }
 0x100   :  { %114 = vsyncpa [#allocation6], 1 }

</bundles_post_ra>
